<compile_context>
chip_gen: v7x
topology: tpu7x:2x2x1
jax: 0.10.0
libtpu: 0.0.40
codegen_flags: <defaults>
</compile_context>

<pallas_src>
import functools
import math

import jax
import jax.numpy as jnp
from jax.experimental import pallas as pl
from jax.experimental.pallas import tpu as pltpu


def _layernorm(v, gamma, beta, eps=1e-5):
    mu = jnp.mean(v, axis=-1, keepdims=True)
    var = jnp.mean((v - mu) ** 2, axis=-1, keepdims=True)
    return (v - mu) * jax.lax.rsqrt(var + eps) * gamma + beta


def _gelu_exact(v):
    # PyTorch nn.GELU() default: exact erf-based GELU (kept exact for parity;
    # tanh-approx is only a minor v5e-specific micro-opt).
    return 0.5 * v * (1.0 + jax.lax.erf(v * (1.0 / math.sqrt(2.0))))


# ----------------------------- kernels ------------------------------------


def attn_block_kernel(
    x_ref, ln1_g_ref, ln1_b_ref,
    wq_ref, bq_ref, wk_ref, bk_ref, wv_ref, bv_ref,
    wproj_ref, bproj_ref,
    o_ref,
    *, num_heads,
):
    """Per batch element: o = x + proj(MHA(LN1(x)))."""
    x = x_ref[0]                                          # (N, C) f32
    h = _layernorm(x, ln1_g_ref[0], ln1_b_ref[0])         # f32
    h_bf = h.astype(jnp.bfloat16)

    # Start from residual + output-projection bias; accumulate per head in f32.
    acc = x + bproj_ref[0]                                # (N, C) f32

    for hd in range(num_heads):                           # static unroll
        # Per-head weights are leading-dim slices (free); scale pre-folded into wq/bq.
        q = (jnp.dot(h_bf, wq_ref[hd], preferred_element_type=jnp.float32)
             + bq_ref[hd]).astype(jnp.bfloat16)           # (N, D)
        k = (jnp.dot(h_bf, wk_ref[hd], preferred_element_type=jnp.float32)
             + bk_ref[hd]).astype(jnp.bfloat16)           # (N, D)
        v = (jnp.dot(h_bf, wv_ref[hd], preferred_element_type=jnp.float32)
             + bv_ref[hd]).astype(jnp.bfloat16)           # (N, D)

        # Scores: contract last dims directly -> no k.T materialization.
        s = jax.lax.dot_general(
            q, k, (((1,), (1,)), ((), ())),
            preferred_element_type=jnp.float32)           # (N, N) f32
        s = s - jnp.max(s, axis=-1, keepdims=True)
        p = jnp.exp(s)
        p = p * pl.reciprocal(jnp.sum(p, axis=-1, keepdims=True), approx=True)

        ctx = jnp.dot(p.astype(jnp.bfloat16), v,
                      preferred_element_type=jnp.float32)  # (N, D) f32
        # Head-merge + output projection fused: accumulate ctx_h @ Wproj[h].
        acc = acc + jnp.dot(ctx.astype(jnp.bfloat16), wproj_ref[hd],
                            preferred_element_type=jnp.float32)  # (N, C)

    o_ref[0] = acc.astype(o_ref.dtype)


def mlp_block_kernel(y_ref, ln2_g_ref, ln2_b_ref,
                     w1_ref, b1_ref, w2_ref, b2_ref, o_ref):
    """Per token tile: o = y + fc2(GELU(fc1(LN2(y))))."""
    y = y_ref[...]                                        # (TM, C) f32
    h = _layernorm(y, ln2_g_ref[0], ln2_b_ref[0])
    t = jnp.dot(h.astype(jnp.bfloat16), w1_ref[...],
                preferred_element_type=jnp.float32) + b1_ref[0]   # (TM, H) f32
    t = _gelu_exact(t)
    t = jnp.dot(t.astype(jnp.bfloat16), w2_ref[...],
                preferred_element_type=jnp.float32) + b2_ref[0]   # (TM, C) f32
    o_ref[...] = (y + t).astype(o_ref.dtype)


# ----------------------------- wrapper -------------------------------------


def _nbytes(a):
    return int(a.size) * a.dtype.itemsize


def _vmem_limit_bytes(block_bytes, headroom=16 << 20):
    # Resident blocks are double-buffered by the pipeline; cap at v7x physical VMEM.
    return int(min(max(2 * block_bytes + headroom, 32 << 20), 64 << 20))


def _full_spec(a):
    return pl.BlockSpec(a.shape, lambda *args: (0,) * len(a.shape))


def transformer_block(x, params, *, num_heads):
    """x: (B, N, C) float32. Mirrors TransformerBlock.forward."""
    B, N, C = x.shape
    D = C // num_heads
    H = params["w1"].shape[1]
    scale = D ** (-0.5)
    bf16 = jnp.bfloat16

    # ---- host-side weight re-layout (outside the kernels, done once) ----
    def split_heads_cols(w):                   # (C, C) -> (Hn, C, D)
        return jnp.transpose(w.reshape(C, num_heads, D), (1, 0, 2))

    wq = split_heads_cols(params["wqkv"][:, 0 * C:1 * C] * scale).astype(bf16)
    wk = split_heads_cols(params["wqkv"][:, 1 * C:2 * C]).astype(bf16)
    wv = split_heads_cols(params["wqkv"][:, 2 * C:3 * C]).astype(bf16)
    bq = (params["bqkv"][0, 0 * C:1 * C] * scale).reshape(num_heads, 1, D)
    bk = params["bqkv"][0, 1 * C:2 * C].reshape(num_heads, 1, D)
    bv = params["bqkv"][0, 2 * C:3 * C].reshape(num_heads, 1, D)
    wproj = params["wproj"].reshape(num_heads, D, C).astype(bf16)
    bproj = params["bproj"]

    ln1_g, ln1_b = params["ln1_g"], params["ln1_b"]
    ln2_g, ln2_b = params["ln2_g"], params["ln2_b"]
    w1 = params["w1"].astype(bf16)
    b1 = params["b1"]
    w2 = params["w2"].astype(bf16)
    b2 = params["b2"]

    # ------------- attention + residual: grid over batch -------------
    attn_args = (x, ln1_g, ln1_b, wq, bq, wk, bk, wv, bv, wproj, bproj)
    attn_block_bytes = (2 * N * C * x.dtype.itemsize
                        + sum(_nbytes(a) for a in attn_args[1:]))
    y = pl.pallas_call(
        functools.partial(attn_block_kernel, num_heads=num_heads),
        out_shape=jax.ShapeDtypeStruct((B, N, C), x.dtype),
        grid_spec=pltpu.PrefetchScalarGridSpec(
            num_scalar_prefetch=0,
            grid=(B,),
            in_specs=[pl.BlockSpec((1, N, C), lambda b: (b, 0, 0))]
                     + [_full_spec(a) for a in attn_args[1:]],
            out_specs=pl.BlockSpec((1, N, C), lambda b: (b, 0, 0)),
        ),
        compiler_params=pltpu.CompilerParams(
            dimension_semantics=("parallel",),
            vmem_limit_bytes=_vmem_limit_bytes(attn_block_bytes),
        ),
    )(*attn_args)

    # ------------- MLP + residual: grid over token tiles -------------
    BN = B * N
    TM = next((t for t in (256, 128) if BN % t == 0), BN)   # 256-wide feeds when possible
    y2 = y.reshape(BN, C)
    mlp_args = (y2, ln2_g, ln2_b, w1, b1, w2, b2)
    mlp_block_bytes = (2 * TM * C * x.dtype.itemsize + TM * H * 4
                       + sum(_nbytes(a) for a in mlp_args[1:]))
    out2 = pl.pallas_call(
        mlp_block_kernel,
        out_shape=jax.ShapeDtypeStruct((BN, C), x.dtype),
        grid_spec=pltpu.PrefetchScalarGridSpec(
            num_scalar_prefetch=0,
            grid=(BN // TM,),
            in_specs=[pl.BlockSpec((TM, C), lambda i: (i, 0))]
                     + [_full_spec(a) for a in mlp_args[1:]],
            out_specs=pl.BlockSpec((TM, C), lambda i: (i, 0)),
        ),
        compiler_params=pltpu.CompilerParams(
            dimension_semantics=("parallel",),
            vmem_limit_bytes=_vmem_limit_bytes(mlp_block_bytes),
        ),
    )(*mlp_args)
    return out2.reshape(B, N, C)


# ------------------------ params / reference --------------------------------


def init_params(key, embed_dim, mlp_ratio=4.0):
    """Deterministic synthetic params matching the PyTorch module's shapes.

    Weights are stored transposed relative to nn.Linear (in_dim, out_dim)
    so kernels compute x @ W + b directly."""
    hidden = int(embed_dim * mlp_ratio)
    keys = jax.random.split(key, 6)

    def linear(k, din, dout):
        lim = 1.0 / math.sqrt(din)
        kw, kb = jax.random.split(k)
        w = jax.random.uniform(kw, (din, dout), jnp.float32, -lim, lim)
        b = jax.random.uniform(kb, (1, dout), jnp.float32, -lim, lim)
        return w, b

    wqkv, bqkv = linear(keys[0], embed_dim, 3 * embed_dim)
    wproj, bproj = linear(keys[1], embed_dim, embed_dim)
    w1, b1 = linear(keys[2], embed_dim, hidden)
    w2, b2 = linear(keys[3], hidden, embed_dim)

    return {
        "ln1_g": jnp.ones((1, embed_dim), jnp.float32),
        "ln1_b": jnp.zeros((1, embed_dim), jnp.float32),
        "wqkv": wqkv, "bqkv": bqkv,
        "wproj": wproj, "bproj": bproj,
        "ln2_g": jnp.ones((1, embed_dim), jnp.float32),
        "ln2_b": jnp.zeros((1, embed_dim), jnp.float32),
        "w1": w1, "b1": b1,
        "w2": w2, "b2": b2,
    }


def transformer_block_ref(x, p, *, num_heads):
    """Pure-JAX f32 reference (mirrors the PyTorch forward) for validation."""
    B, N, C = x.shape
    D = C // num_heads
    scale = D ** (-0.5)

    def ln(v, g, b):
        mu = v.mean(-1, keepdims=True)
        var = ((v - mu) ** 2).mean(-1, keepdims=True)
        return (v - mu) / jnp.sqrt(var + 1e-5) * g + b

    h = ln(x, p["ln1_g"][0], p["ln1_b"][0])
    qkv = h @ p["wqkv"] + p["bqkv"][0]
    q, k, v = jnp.split(qkv, 3, axis=-1)
    reshape = lambda t: t.reshape(B, N, num_heads, D).transpose(0, 2, 1, 3)
    q, k, v = map(reshape, (q, k, v))
    attn = jax.nn.softmax(q @ k.transpose(0, 1, 3, 2) * scale, axis=-1)
    o = (attn @ v).transpose(0, 2, 1, 3).reshape(B, N, C)
    x = x + (o @ p["wproj"] + p["bproj"][0])

    h2 = ln(x, p["ln2_g"][0], p["ln2_b"][0])
    h2 = h2 @ p["w1"] + p["b1"][0]
    h2 = jax.nn.gelu(h2, approximate=False)
    h2 = h2 @ p["w2"] + p["b2"][0]
    return x + h2


if __name__ == "__main__":
    B, N, C = 2, 8, 32
    NUM_HEADS = 4

    key = jax.random.PRNGKey(0)
    kx, kp = jax.random.split(key)
    x = jax.random.normal(kx, (B, N, C), jnp.float32)
    params = init_params(kp, C)

    out = transformer_block(x, params, num_heads=NUM_HEADS)
    out = jax.block_until_ready(out)

    ref = transformer_block_ref(x, params, num_heads=NUM_HEADS)
    assert out.shape == (B, N, C)
    # bf16 MXU matmuls + approx reciprocal -> compare against the f32 reference
    # with a correspondingly loosened tolerance.
    err = float(jnp.max(jnp.abs(out - ref)))
    assert jnp.allclose(out, ref, atol=5e-2, rtol=5e-2), f"max abs err {err}"

    print("KERNEL_OK")
</pallas_src>

<mosaic_0001>
module attributes {stable_mosaic.version = 11 : i64} {
  func.func @attn_block_kernel(%arg0: i32, %arg1: memref<1x8x32xf32, #tpu.memory_space<vmem>>, %arg2: memref<1x32xf32, #tpu.memory_space<vmem>>, %arg3: memref<1x32xf32, #tpu.memory_space<vmem>>, %arg4: memref<4x32x8xbf16, #tpu.memory_space<vmem>>, %arg5: memref<4x1x8xf32, #tpu.memory_space<vmem>>, %arg6: memref<4x32x8xbf16, #tpu.memory_space<vmem>>, %arg7: memref<4x1x8xf32, #tpu.memory_space<vmem>>, %arg8: memref<4x32x8xbf16, #tpu.memory_space<vmem>>, %arg9: memref<4x1x8xf32, #tpu.memory_space<vmem>>, %arg10: memref<4x8x32xbf16, #tpu.memory_space<vmem>>, %arg11: memref<1x32xf32, #tpu.memory_space<vmem>>, %arg12: memref<1x8x32xf32, #tpu.memory_space<vmem>>) attributes {dimension_semantics = [#tpu.dimension_semantics<parallel>], iteration_bounds = array<i64: 2>, scalar_prefetch = 0 : i64, scratch_operands = 0 : i64, tpu.core_type = #tpu.core_type<tc>, window_params = [{transform_indices = @transform_0, window_bounds = array<i64: 1, 8, 32>}, {pipeline_mode = #tpu.pipeline_mode<synchronous>, transform_indices = @transform_1, window_bounds = array<i64: 1, 32>}, {pipeline_mode = #tpu.pipeline_mode<synchronous>, transform_indices = @transform_2, window_bounds = array<i64: 1, 32>}, {pipeline_mode = #tpu.pipeline_mode<synchronous>, transform_indices = @transform_3, window_bounds = array<i64: 4, 32, 8>}, {pipeline_mode = #tpu.pipeline_mode<synchronous>, transform_indices = @transform_4, window_bounds = array<i64: 4, 1, 8>}, {pipeline_mode = #tpu.pipeline_mode<synchronous>, transform_indices = @transform_5, window_bounds = array<i64: 4, 32, 8>}, {pipeline_mode = #tpu.pipeline_mode<synchronous>, transform_indices = @transform_6, window_bounds = array<i64: 4, 1, 8>}, {pipeline_mode = #tpu.pipeline_mode<synchronous>, transform_indices = @transform_7, window_bounds = array<i64: 4, 32, 8>}, {pipeline_mode = #tpu.pipeline_mode<synchronous>, transform_indices = @transform_8, window_bounds = array<i64: 4, 1, 8>}, {pipeline_mode = #tpu.pipeline_mode<synchronous>, transform_indices = @transform_9, window_bounds = array<i64: 4, 8, 32>}, {pipeline_mode = #tpu.pipeline_mode<synchronous>, transform_indices = @transform_10, window_bounds = array<i64: 1, 32>}, {transform_indices = @transform_11, window_bounds = array<i64: 1, 8, 32>}]} {
    %c0 = arith.constant 0 : index
    %c0_0 = arith.constant 0 : index
    %c0_1 = arith.constant 0 : index
    %0 = vector.load %arg1[%c0, %c0_0, %c0_1] : memref<1x8x32xf32, #tpu.memory_space<vmem>>, vector<1x8x32xf32>
    %1 = vector.shape_cast %0 : vector<1x8x32xf32> to vector<8x32xf32>
    %c0_2 = arith.constant 0 : index
    %c0_3 = arith.constant 0 : index
    %2 = vector.load %arg2[%c0_2, %c0_3] : memref<1x32xf32, #tpu.memory_space<vmem>>, vector<1x32xf32>
    %3 = vector.shape_cast %2 : vector<1x32xf32> to vector<32xf32>
    %c0_4 = arith.constant 0 : index
    %c0_5 = arith.constant 0 : index
    %4 = vector.load %arg3[%c0_4, %c0_5] : memref<1x32xf32, #tpu.memory_space<vmem>>, vector<1x32xf32>
    %5 = vector.shape_cast %4 : vector<1x32xf32> to vector<32xf32>
    %cst = arith.constant dense<0.000000e+00> : vector<8xf32>
    %6 = vector.multi_reduction <add>, %1, %cst [1] : vector<8x32xf32> to vector<8xf32>
    %7 = vector.shape_cast %6 : vector<8xf32> to vector<8x1xf32>
    %cst_6 = arith.constant 3.200000e+01 : f32
    %8 = vector.broadcast %cst_6 : f32 to vector<8x1xf32>
    %9 = arith.divf %7, %8 : vector<8x1xf32>
    %10 = vector.broadcast %9 : vector<8x1xf32> to vector<8x32xf32>
    %11 = arith.subf %1, %10 : vector<8x32xf32>
    %12 = arith.mulf %11, %11 : vector<8x32xf32>
    %cst_7 = arith.constant dense<0.000000e+00> : vector<8xf32>
    %13 = vector.multi_reduction <add>, %12, %cst_7 [1] : vector<8x32xf32> to vector<8xf32>
    %14 = vector.shape_cast %13 : vector<8xf32> to vector<8x1xf32>
    %cst_8 = arith.constant 3.200000e+01 : f32
    %15 = vector.broadcast %cst_8 : f32 to vector<8x1xf32>
    %16 = arith.divf %14, %15 : vector<8x1xf32>
    %17 = vector.broadcast %9 : vector<8x1xf32> to vector<8x32xf32>
    %18 = arith.subf %1, %17 : vector<8x32xf32>
    %cst_9 = arith.constant 9.99999974E-6 : f32
    %19 = vector.broadcast %cst_9 : f32 to vector<8x1xf32>
    %20 = arith.addf %16, %19 : vector<8x1xf32>
    %21 = math.rsqrt %20 : vector<8x1xf32>
    %22 = vector.broadcast %21 : vector<8x1xf32> to vector<8x32xf32>
    %23 = arith.mulf %18, %22 : vector<8x32xf32>
    %24 = vector.shape_cast %3 : vector<32xf32> to vector<1x32xf32>
    %25 = vector.broadcast %24 : vector<1x32xf32> to vector<8x32xf32>
    %26 = arith.mulf %23, %25 : vector<8x32xf32>
    %27 = vector.shape_cast %5 : vector<32xf32> to vector<1x32xf32>
    %28 = vector.broadcast %27 : vector<1x32xf32> to vector<8x32xf32>
    %29 = arith.addf %26, %28 : vector<8x32xf32>
    %30 = arith.truncf %29 : vector<8x32xf32> to vector<8x32xbf16>
    %c0_10 = arith.constant 0 : index
    %c0_11 = arith.constant 0 : index
    %31 = vector.load %arg11[%c0_10, %c0_11] : memref<1x32xf32, #tpu.memory_space<vmem>>, vector<1x32xf32>
    %32 = vector.shape_cast %31 : vector<1x32xf32> to vector<32xf32>
    %33 = vector.shape_cast %32 : vector<32xf32> to vector<1x32xf32>
    %34 = vector.broadcast %33 : vector<1x32xf32> to vector<8x32xf32>
    %35 = arith.addf %1, %34 : vector<8x32xf32>
    %c0_12 = arith.constant 0 : index
    %c0_13 = arith.constant 0 : index
    %c0_14 = arith.constant 0 : index
    %36 = vector.load %arg4[%c0_12, %c0_13, %c0_14] : memref<4x32x8xbf16, #tpu.memory_space<vmem>>, vector<1x32x8xbf16>
    %37 = vector.shape_cast %36 : vector<1x32x8xbf16> to vector<32x8xbf16>
    %cst_15 = arith.constant dense<0.000000e+00> : vector<8x8xf32>
    %38 = tpu.matmul %30, %37, %cst_15 {dimension_numbers = #tpu.dot_dimension_numbers<[1], [0], [0], [1], [0, 0, 1, 1], [], []>} : vector<8x32xbf16>, vector<32x8xbf16>, vector<8x8xf32> -> vector<8x8xf32>
    %c0_16 = arith.constant 0 : index
    %c0_17 = arith.constant 0 : index
    %c0_18 = arith.constant 0 : index
    %39 = vector.load %arg5[%c0_16, %c0_17, %c0_18] : memref<4x1x8xf32, #tpu.memory_space<vmem>>, vector<1x1x8xf32>
    %40 = vector.shape_cast %39 : vector<1x1x8xf32> to vector<1x8xf32>
    %41 = vector.broadcast %40 : vector<1x8xf32> to vector<8x8xf32>
    %42 = arith.addf %38, %41 : vector<8x8xf32>
    %43 = arith.truncf %42 : vector<8x8xf32> to vector<8x8xbf16>
    %c0_19 = arith.constant 0 : index
    %c0_20 = arith.constant 0 : index
    %c0_21 = arith.constant 0 : index
    %44 = vector.load %arg6[%c0_19, %c0_20, %c0_21] : memref<4x32x8xbf16, #tpu.memory_space<vmem>>, vector<1x32x8xbf16>
    %45 = vector.shape_cast %44 : vector<1x32x8xbf16> to vector<32x8xbf16>
    %cst_22 = arith.constant dense<0.000000e+00> : vector<8x8xf32>
    %46 = tpu.matmul %30, %45, %cst_22 {dimension_numbers = #tpu.dot_dimension_numbers<[1], [0], [0], [1], [0, 0, 1, 1], [], []>} : vector<8x32xbf16>, vector<32x8xbf16>, vector<8x8xf32> -> vector<8x8xf32>
    %c0_23 = arith.constant 0 : index
    %c0_24 = arith.constant 0 : index
    %c0_25 = arith.constant 0 : index
    %47 = vector.load %arg7[%c0_23, %c0_24, %c0_25] : memref<4x1x8xf32, #tpu.memory_space<vmem>>, vector<1x1x8xf32>
    %48 = vector.shape_cast %47 : vector<1x1x8xf32> to vector<1x8xf32>
    %49 = vector.broadcast %48 : vector<1x8xf32> to vector<8x8xf32>
    %50 = arith.addf %46, %49 : vector<8x8xf32>
    %51 = arith.truncf %50 : vector<8x8xf32> to vector<8x8xbf16>
    %c0_26 = arith.constant 0 : index
    %c0_27 = arith.constant 0 : index
    %c0_28 = arith.constant 0 : index
    %52 = vector.load %arg8[%c0_26, %c0_27, %c0_28] : memref<4x32x8xbf16, #tpu.memory_space<vmem>>, vector<1x32x8xbf16>
    %53 = vector.shape_cast %52 : vector<1x32x8xbf16> to vector<32x8xbf16>
    %cst_29 = arith.constant dense<0.000000e+00> : vector<8x8xf32>
    %54 = tpu.matmul %30, %53, %cst_29 {dimension_numbers = #tpu.dot_dimension_numbers<[1], [0], [0], [1], [0, 0, 1, 1], [], []>} : vector<8x32xbf16>, vector<32x8xbf16>, vector<8x8xf32> -> vector<8x8xf32>
    %c0_30 = arith.constant 0 : index
    %c0_31 = arith.constant 0 : index
    %c0_32 = arith.constant 0 : index
    %55 = vector.load %arg9[%c0_30, %c0_31, %c0_32] : memref<4x1x8xf32, #tpu.memory_space<vmem>>, vector<1x1x8xf32>
    %56 = vector.shape_cast %55 : vector<1x1x8xf32> to vector<1x8xf32>
    %57 = vector.broadcast %56 : vector<1x8xf32> to vector<8x8xf32>
    %58 = arith.addf %54, %57 : vector<8x8xf32>
    %59 = arith.truncf %58 : vector<8x8xf32> to vector<8x8xbf16>
    %cst_33 = arith.constant dense<0.000000e+00> : vector<8x8xf32>
    %60 = tpu.matmul %43, %51, %cst_33 {dimension_numbers = #tpu.dot_dimension_numbers<[1], [1], [0], [0], [0, 0, 1, 0], [], []>} : vector<8x8xbf16>, vector<8x8xbf16>, vector<8x8xf32> -> vector<8x8xf32>
    %cst_34 = arith.constant dense<0xFF800000> : vector<8xf32>
    %61 = vector.multi_reduction <maximumf>, %60, %cst_34 [1] : vector<8x8xf32> to vector<8xf32>
    %62 = vector.shape_cast %61 : vector<8xf32> to vector<8x1xf32>
    %63 = vector.broadcast %62 : vector<8x1xf32> to vector<8x8xf32>
    %64 = arith.subf %60, %63 : vector<8x8xf32>
    %65 = math.exp %64 : vector<8x8xf32>
    %cst_35 = arith.constant dense<0.000000e+00> : vector<8xf32>
    %66 = vector.multi_reduction <add>, %65, %cst_35 [1] : vector<8x8xf32> to vector<8xf32>
    %67 = vector.shape_cast %66 : vector<8xf32> to vector<8x1xf32>
    %68 = tpu.reciprocal %67 {approx = true} : vector<8x1xf32> -> vector<8x1xf32>
    %69 = vector.broadcast %68 : vector<8x1xf32> to vector<8x8xf32>
    %70 = arith.mulf %65, %69 : vector<8x8xf32>
    %71 = arith.truncf %70 : vector<8x8xf32> to vector<8x8xbf16>
    %cst_36 = arith.constant dense<0.000000e+00> : vector<8x8xf32>
    %72 = tpu.matmul %71, %59, %cst_36 {dimension_numbers = #tpu.dot_dimension_numbers<[1], [0], [0], [1], [0, 0, 1, 1], [], []>} : vector<8x8xbf16>, vector<8x8xbf16>, vector<8x8xf32> -> vector<8x8xf32>
    %73 = arith.truncf %72 : vector<8x8xf32> to vector<8x8xbf16>
    %c0_37 = arith.constant 0 : index
    %c0_38 = arith.constant 0 : index
    %c0_39 = arith.constant 0 : index
    %74 = vector.load %arg10[%c0_37, %c0_38, %c0_39] : memref<4x8x32xbf16, #tpu.memory_space<vmem>>, vector<1x8x32xbf16>
    %75 = vector.shape_cast %74 : vector<1x8x32xbf16> to vector<8x32xbf16>
    %cst_40 = arith.constant dense<0.000000e+00> : vector<8x32xf32>
    %76 = tpu.matmul %73, %75, %cst_40 {dimension_numbers = #tpu.dot_dimension_numbers<[1], [0], [0], [1], [0, 0, 1, 1], [], []>} : vector<8x8xbf16>, vector<8x32xbf16>, vector<8x32xf32> -> vector<8x32xf32>
    %77 = arith.addf %35, %76 : vector<8x32xf32>
    %c1 = arith.constant 1 : index
    %c0_41 = arith.constant 0 : index
    %c0_42 = arith.constant 0 : index
    %78 = vector.load %arg4[%c1, %c0_41, %c0_42] : memref<4x32x8xbf16, #tpu.memory_space<vmem>>, vector<1x32x8xbf16>
    %79 = vector.shape_cast %78 : vector<1x32x8xbf16> to vector<32x8xbf16>
    %cst_43 = arith.constant dense<0.000000e+00> : vector<8x8xf32>
    %80 = tpu.matmul %30, %79, %cst_43 {dimension_numbers = #tpu.dot_dimension_numbers<[1], [0], [0], [1], [0, 0, 1, 1], [], []>} : vector<8x32xbf16>, vector<32x8xbf16>, vector<8x8xf32> -> vector<8x8xf32>
    %c1_44 = arith.constant 1 : index
    %c0_45 = arith.constant 0 : index
    %c0_46 = arith.constant 0 : index
    %81 = vector.load %arg5[%c1_44, %c0_45, %c0_46] : memref<4x1x8xf32, #tpu.memory_space<vmem>>, vector<1x1x8xf32>
    %82 = vector.shape_cast %81 : vector<1x1x8xf32> to vector<1x8xf32>
    %83 = vector.broadcast %82 : vector<1x8xf32> to vector<8x8xf32>
    %84 = arith.addf %80, %83 : vector<8x8xf32>
    %85 = arith.truncf %84 : vector<8x8xf32> to vector<8x8xbf16>
    %c1_47 = arith.constant 1 : index
    %c0_48 = arith.constant 0 : index
    %c0_49 = arith.constant 0 : index
    %86 = vector.load %arg6[%c1_47, %c0_48, %c0_49] : memref<4x32x8xbf16, #tpu.memory_space<vmem>>, vector<1x32x8xbf16>
    %87 = vector.shape_cast %86 : vector<1x32x8xbf16> to vector<32x8xbf16>
    %cst_50 = arith.constant dense<0.000000e+00> : vector<8x8xf32>
    %88 = tpu.matmul %30, %87, %cst_50 {dimension_numbers = #tpu.dot_dimension_numbers<[1], [0], [0], [1], [0, 0, 1, 1], [], []>} : vector<8x32xbf16>, vector<32x8xbf16>, vector<8x8xf32> -> vector<8x8xf32>
    %c1_51 = arith.constant 1 : index
    %c0_52 = arith.constant 0 : index
    %c0_53 = arith.constant 0 : index
    %89 = vector.load %arg7[%c1_51, %c0_52, %c0_53] : memref<4x1x8xf32, #tpu.memory_space<vmem>>, vector<1x1x8xf32>
    %90 = vector.shape_cast %89 : vector<1x1x8xf32> to vector<1x8xf32>
    %91 = vector.broadcast %90 : vector<1x8xf32> to vector<8x8xf32>
    %92 = arith.addf %88, %91 : vector<8x8xf32>
    %93 = arith.truncf %92 : vector<8x8xf32> to vector<8x8xbf16>
    %c1_54 = arith.constant 1 : index
    %c0_55 = arith.constant 0 : index
    %c0_56 = arith.constant 0 : index
    %94 = vector.load %arg8[%c1_54, %c0_55, %c0_56] : memref<4x32x8xbf16, #tpu.memory_space<vmem>>, vector<1x32x8xbf16>
    %95 = vector.shape_cast %94 : vector<1x32x8xbf16> to vector<32x8xbf16>
    %cst_57 = arith.constant dense<0.000000e+00> : vector<8x8xf32>
    %96 = tpu.matmul %30, %95, %cst_57 {dimension_numbers = #tpu.dot_dimension_numbers<[1], [0], [0], [1], [0, 0, 1, 1], [], []>} : vector<8x32xbf16>, vector<32x8xbf16>, vector<8x8xf32> -> vector<8x8xf32>
    %c1_58 = arith.constant 1 : index
    %c0_59 = arith.constant 0 : index
    %c0_60 = arith.constant 0 : index
    %97 = vector.load %arg9[%c1_58, %c0_59, %c0_60] : memref<4x1x8xf32, #tpu.memory_space<vmem>>, vector<1x1x8xf32>
    %98 = vector.shape_cast %97 : vector<1x1x8xf32> to vector<1x8xf32>
    %99 = vector.broadcast %98 : vector<1x8xf32> to vector<8x8xf32>
    %100 = arith.addf %96, %99 : vector<8x8xf32>
    %101 = arith.truncf %100 : vector<8x8xf32> to vector<8x8xbf16>
    %cst_61 = arith.constant dense<0.000000e+00> : vector<8x8xf32>
    %102 = tpu.matmul %85, %93, %cst_61 {dimension_numbers = #tpu.dot_dimension_numbers<[1], [1], [0], [0], [0, 0, 1, 0], [], []>} : vector<8x8xbf16>, vector<8x8xbf16>, vector<8x8xf32> -> vector<8x8xf32>
    %cst_62 = arith.constant dense<0xFF800000> : vector<8xf32>
    %103 = vector.multi_reduction <maximumf>, %102, %cst_62 [1] : vector<8x8xf32> to vector<8xf32>
    %104 = vector.shape_cast %103 : vector<8xf32> to vector<8x1xf32>
    %105 = vector.broadcast %104 : vector<8x1xf32> to vector<8x8xf32>
    %106 = arith.subf %102, %105 : vector<8x8xf32>
    %107 = math.exp %106 : vector<8x8xf32>
    %cst_63 = arith.constant dense<0.000000e+00> : vector<8xf32>
    %108 = vector.multi_reduction <add>, %107, %cst_63 [1] : vector<8x8xf32> to vector<8xf32>
    %109 = vector.shape_cast %108 : vector<8xf32> to vector<8x1xf32>
    %110 = tpu.reciprocal %109 {approx = true} : vector<8x1xf32> -> vector<8x1xf32>
    %111 = vector.broadcast %110 : vector<8x1xf32> to vector<8x8xf32>
    %112 = arith.mulf %107, %111 : vector<8x8xf32>
    %113 = arith.truncf %112 : vector<8x8xf32> to vector<8x8xbf16>
    %cst_64 = arith.constant dense<0.000000e+00> : vector<8x8xf32>
    %114 = tpu.matmul %113, %101, %cst_64 {dimension_numbers = #tpu.dot_dimension_numbers<[1], [0], [0], [1], [0, 0, 1, 1], [], []>} : vector<8x8xbf16>, vector<8x8xbf16>, vector<8x8xf32> -> vector<8x8xf32>
    %115 = arith.truncf %114 : vector<8x8xf32> to vector<8x8xbf16>
    %c1_65 = arith.constant 1 : index
    %c0_66 = arith.constant 0 : index
    %c0_67 = arith.constant 0 : index
    %116 = vector.load %arg10[%c1_65, %c0_66, %c0_67] : memref<4x8x32xbf16, #tpu.memory_space<vmem>>, vector<1x8x32xbf16>
    %117 = vector.shape_cast %116 : vector<1x8x32xbf16> to vector<8x32xbf16>
    %cst_68 = arith.constant dense<0.000000e+00> : vector<8x32xf32>
    %118 = tpu.matmul %115, %117, %cst_68 {dimension_numbers = #tpu.dot_dimension_numbers<[1], [0], [0], [1], [0, 0, 1, 1], [], []>} : vector<8x8xbf16>, vector<8x32xbf16>, vector<8x32xf32> -> vector<8x32xf32>
    %119 = arith.addf %77, %118 : vector<8x32xf32>
    %c2 = arith.constant 2 : index
    %c0_69 = arith.constant 0 : index
    %c0_70 = arith.constant 0 : index
    %120 = vector.load %arg4[%c2, %c0_69, %c0_70] : memref<4x32x8xbf16, #tpu.memory_space<vmem>>, vector<1x32x8xbf16>
    %121 = vector.shape_cast %120 : vector<1x32x8xbf16> to vector<32x8xbf16>
    %cst_71 = arith.constant dense<0.000000e+00> : vector<8x8xf32>
    %122 = tpu.matmul %30, %121, %cst_71 {dimension_numbers = #tpu.dot_dimension_numbers<[1], [0], [0], [1], [0, 0, 1, 1], [], []>} : vector<8x32xbf16>, vector<32x8xbf16>, vector<8x8xf32> -> vector<8x8xf32>
    %c2_72 = arith.constant 2 : index
    %c0_73 = arith.constant 0 : index
    %c0_74 = arith.constant 0 : index
    %123 = vector.load %arg5[%c2_72, %c0_73, %c0_74] : memref<4x1x8xf32, #tpu.memory_space<vmem>>, vector<1x1x8xf32>
    %124 = vector.shape_cast %123 : vector<1x1x8xf32> to vector<1x8xf32>
    %125 = vector.broadcast %124 : vector<1x8xf32> to vector<8x8xf32>
    %126 = arith.addf %122, %125 : vector<8x8xf32>
    %127 = arith.truncf %126 : vector<8x8xf32> to vector<8x8xbf16>
    %c2_75 = arith.constant 2 : index
    %c0_76 = arith.constant 0 : index
    %c0_77 = arith.constant 0 : index
    %128 = vector.load %arg6[%c2_75, %c0_76, %c0_77] : memref<4x32x8xbf16, #tpu.memory_space<vmem>>, vector<1x32x8xbf16>
    %129 = vector.shape_cast %128 : vector<1x32x8xbf16> to vector<32x8xbf16>
    %cst_78 = arith.constant dense<0.000000e+00> : vector<8x8xf32>
    %130 = tpu.matmul %30, %129, %cst_78 {dimension_numbers = #tpu.dot_dimension_numbers<[1], [0], [0], [1], [0, 0, 1, 1], [], []>} : vector<8x32xbf16>, vector<32x8xbf16>, vector<8x8xf32> -> vector<8x8xf32>
    %c2_79 = arith.constant 2 : index
    %c0_80 = arith.constant 0 : index
    %c0_81 = arith.constant 0 : index
    %131 = vector.load %arg7[%c2_79, %c0_80, %c0_81] : memref<4x1x8xf32, #tpu.memory_space<vmem>>, vector<1x1x8xf32>
    %132 = vector.shape_cast %131 : vector<1x1x8xf32> to vector<1x8xf32>
    %133 = vector.broadcast %132 : vector<1x8xf32> to vector<8x8xf32>
    %134 = arith.addf %130, %133 : vector<8x8xf32>
    %135 = arith.truncf %134 : vector<8x8xf32> to vector<8x8xbf16>
    %c2_82 = arith.constant 2 : index
    %c0_83 = arith.constant 0 : index
    %c0_84 = arith.constant 0 : index
    %136 = vector.load %arg8[%c2_82, %c0_83, %c0_84] : memref<4x32x8xbf16, #tpu.memory_space<vmem>>, vector<1x32x8xbf16>
    %137 = vector.shape_cast %136 : vector<1x32x8xbf16> to vector<32x8xbf16>
    %cst_85 = arith.constant dense<0.000000e+00> : vector<8x8xf32>
    %138 = tpu.matmul %30, %137, %cst_85 {dimension_numbers = #tpu.dot_dimension_numbers<[1], [0], [0], [1], [0, 0, 1, 1], [], []>} : vector<8x32xbf16>, vector<32x8xbf16>, vector<8x8xf32> -> vector<8x8xf32>
    %c2_86 = arith.constant 2 : index
    %c0_87 = arith.constant 0 : index
    %c0_88 = arith.constant 0 : index
    %139 = vector.load %arg9[%c2_86, %c0_87, %c0_88] : memref<4x1x8xf32, #tpu.memory_space<vmem>>, vector<1x1x8xf32>
    %140 = vector.shape_cast %139 : vector<1x1x8xf32> to vector<1x8xf32>
    %141 = vector.broadcast %140 : vector<1x8xf32> to vector<8x8xf32>
    %142 = arith.addf %138, %141 : vector<8x8xf32>
    %143 = arith.truncf %142 : vector<8x8xf32> to vector<8x8xbf16>
    %cst_89 = arith.constant dense<0.000000e+00> : vector<8x8xf32>
    %144 = tpu.matmul %127, %135, %cst_89 {dimension_numbers = #tpu.dot_dimension_numbers<[1], [1], [0], [0], [0, 0, 1, 0], [], []>} : vector<8x8xbf16>, vector<8x8xbf16>, vector<8x8xf32> -> vector<8x8xf32>
    %cst_90 = arith.constant dense<0xFF800000> : vector<8xf32>
    %145 = vector.multi_reduction <maximumf>, %144, %cst_90 [1] : vector<8x8xf32> to vector<8xf32>
    %146 = vector.shape_cast %145 : vector<8xf32> to vector<8x1xf32>
    %147 = vector.broadcast %146 : vector<8x1xf32> to vector<8x8xf32>
    %148 = arith.subf %144, %147 : vector<8x8xf32>
    %149 = math.exp %148 : vector<8x8xf32>
    %cst_91 = arith.constant dense<0.000000e+00> : vector<8xf32>
    %150 = vector.multi_reduction <add>, %149, %cst_91 [1] : vector<8x8xf32> to vector<8xf32>
    %151 = vector.shape_cast %150 : vector<8xf32> to vector<8x1xf32>
    %152 = tpu.reciprocal %151 {approx = true} : vector<8x1xf32> -> vector<8x1xf32>
    %153 = vector.broadcast %152 : vector<8x1xf32> to vector<8x8xf32>
    %154 = arith.mulf %149, %153 : vector<8x8xf32>
    %155 = arith.truncf %154 : vector<8x8xf32> to vector<8x8xbf16>
    %cst_92 = arith.constant dense<0.000000e+00> : vector<8x8xf32>
    %156 = tpu.matmul %155, %143, %cst_92 {dimension_numbers = #tpu.dot_dimension_numbers<[1], [0], [0], [1], [0, 0, 1, 1], [], []>} : vector<8x8xbf16>, vector<8x8xbf16>, vector<8x8xf32> -> vector<8x8xf32>
    %157 = arith.truncf %156 : vector<8x8xf32> to vector<8x8xbf16>
    %c2_93 = arith.constant 2 : index
    %c0_94 = arith.constant 0 : index
    %c0_95 = arith.constant 0 : index
    %158 = vector.load %arg10[%c2_93, %c0_94, %c0_95] : memref<4x8x32xbf16, #tpu.memory_space<vmem>>, vector<1x8x32xbf16>
    %159 = vector.shape_cast %158 : vector<1x8x32xbf16> to vector<8x32xbf16>
    %cst_96 = arith.constant dense<0.000000e+00> : vector<8x32xf32>
    %160 = tpu.matmul %157, %159, %cst_96 {dimension_numbers = #tpu.dot_dimension_numbers<[1], [0], [0], [1], [0, 0, 1, 1], [], []>} : vector<8x8xbf16>, vector<8x32xbf16>, vector<8x32xf32> -> vector<8x32xf32>
    %161 = arith.addf %119, %160 : vector<8x32xf32>
    %c3 = arith.constant 3 : index
    %c0_97 = arith.constant 0 : index
    %c0_98 = arith.constant 0 : index
    %162 = vector.load %arg4[%c3, %c0_97, %c0_98] : memref<4x32x8xbf16, #tpu.memory_space<vmem>>, vector<1x32x8xbf16>
    %163 = vector.shape_cast %162 : vector<1x32x8xbf16> to vector<32x8xbf16>
    %cst_99 = arith.constant dense<0.000000e+00> : vector<8x8xf32>
    %164 = tpu.matmul %30, %163, %cst_99 {dimension_numbers = #tpu.dot_dimension_numbers<[1], [0], [0], [1], [0, 0, 1, 1], [], []>} : vector<8x32xbf16>, vector<32x8xbf16>, vector<8x8xf32> -> vector<8x8xf32>
    %c3_100 = arith.constant 3 : index
    %c0_101 = arith.constant 0 : index
    %c0_102 = arith.constant 0 : index
    %165 = vector.load %arg5[%c3_100, %c0_101, %c0_102] : memref<4x1x8xf32, #tpu.memory_space<vmem>>, vector<1x1x8xf32>
    %166 = vector.shape_cast %165 : vector<1x1x8xf32> to vector<1x8xf32>
    %167 = vector.broadcast %166 : vector<1x8xf32> to vector<8x8xf32>
    %168 = arith.addf %164, %167 : vector<8x8xf32>
    %169 = arith.truncf %168 : vector<8x8xf32> to vector<8x8xbf16>
    %c3_103 = arith.constant 3 : index
    %c0_104 = arith.constant 0 : index
    %c0_105 = arith.constant 0 : index
    %170 = vector.load %arg6[%c3_103, %c0_104, %c0_105] : memref<4x32x8xbf16, #tpu.memory_space<vmem>>, vector<1x32x8xbf16>
    %171 = vector.shape_cast %170 : vector<1x32x8xbf16> to vector<32x8xbf16>
    %cst_106 = arith.constant dense<0.000000e+00> : vector<8x8xf32>
    %172 = tpu.matmul %30, %171, %cst_106 {dimension_numbers = #tpu.dot_dimension_numbers<[1], [0], [0], [1], [0, 0, 1, 1], [], []>} : vector<8x32xbf16>, vector<32x8xbf16>, vector<8x8xf32> -> vector<8x8xf32>
    %c3_107 = arith.constant 3 : index
    %c0_108 = arith.constant 0 : index
    %c0_109 = arith.constant 0 : index
    %173 = vector.load %arg7[%c3_107, %c0_108, %c0_109] : memref<4x1x8xf32, #tpu.memory_space<vmem>>, vector<1x1x8xf32>
    %174 = vector.shape_cast %173 : vector<1x1x8xf32> to vector<1x8xf32>
    %175 = vector.broadcast %174 : vector<1x8xf32> to vector<8x8xf32>
    %176 = arith.addf %172, %175 : vector<8x8xf32>
    %177 = arith.truncf %176 : vector<8x8xf32> to vector<8x8xbf16>
    %c3_110 = arith.constant 3 : index
    %c0_111 = arith.constant 0 : index
    %c0_112 = arith.constant 0 : index
    %178 = vector.load %arg8[%c3_110, %c0_111, %c0_112] : memref<4x32x8xbf16, #tpu.memory_space<vmem>>, vector<1x32x8xbf16>
    %179 = vector.shape_cast %178 : vector<1x32x8xbf16> to vector<32x8xbf16>
    %cst_113 = arith.constant dense<0.000000e+00> : vector<8x8xf32>
    %180 = tpu.matmul %30, %179, %cst_113 {dimension_numbers = #tpu.dot_dimension_numbers<[1], [0], [0], [1], [0, 0, 1, 1], [], []>} : vector<8x32xbf16>, vector<32x8xbf16>, vector<8x8xf32> -> vector<8x8xf32>
    %c3_114 = arith.constant 3 : index
    %c0_115 = arith.constant 0 : index
    %c0_116 = arith.constant 0 : index
    %181 = vector.load %arg9[%c3_114, %c0_115, %c0_116] : memref<4x1x8xf32, #tpu.memory_space<vmem>>, vector<1x1x8xf32>
    %182 = vector.shape_cast %181 : vector<1x1x8xf32> to vector<1x8xf32>
    %183 = vector.broadcast %182 : vector<1x8xf32> to vector<8x8xf32>
    %184 = arith.addf %180, %183 : vector<8x8xf32>
    %185 = arith.truncf %184 : vector<8x8xf32> to vector<8x8xbf16>
    %cst_117 = arith.constant dense<0.000000e+00> : vector<8x8xf32>
    %186 = tpu.matmul %169, %177, %cst_117 {dimension_numbers = #tpu.dot_dimension_numbers<[1], [1], [0], [0], [0, 0, 1, 0], [], []>} : vector<8x8xbf16>, vector<8x8xbf16>, vector<8x8xf32> -> vector<8x8xf32>
    %cst_118 = arith.constant dense<0xFF800000> : vector<8xf32>
    %187 = vector.multi_reduction <maximumf>, %186, %cst_118 [1] : vector<8x8xf32> to vector<8xf32>
    %188 = vector.shape_cast %187 : vector<8xf32> to vector<8x1xf32>
    %189 = vector.broadcast %188 : vector<8x1xf32> to vector<8x8xf32>
    %190 = arith.subf %186, %189 : vector<8x8xf32>
    %191 = math.exp %190 : vector<8x8xf32>
    %cst_119 = arith.constant dense<0.000000e+00> : vector<8xf32>
    %192 = vector.multi_reduction <add>, %191, %cst_119 [1] : vector<8x8xf32> to vector<8xf32>
    %193 = vector.shape_cast %192 : vector<8xf32> to vector<8x1xf32>
    %194 = tpu.reciprocal %193 {approx = true} : vector<8x1xf32> -> vector<8x1xf32>
    %195 = vector.broadcast %194 : vector<8x1xf32> to vector<8x8xf32>
    %196 = arith.mulf %191, %195 : vector<8x8xf32>
    %197 = arith.truncf %196 : vector<8x8xf32> to vector<8x8xbf16>
    %cst_120 = arith.constant dense<0.000000e+00> : vector<8x8xf32>
    %198 = tpu.matmul %197, %185, %cst_120 {dimension_numbers = #tpu.dot_dimension_numbers<[1], [0], [0], [1], [0, 0, 1, 1], [], []>} : vector<8x8xbf16>, vector<8x8xbf16>, vector<8x8xf32> -> vector<8x8xf32>
    %199 = arith.truncf %198 : vector<8x8xf32> to vector<8x8xbf16>
    %c3_121 = arith.constant 3 : index
    %c0_122 = arith.constant 0 : index
    %c0_123 = arith.constant 0 : index
    %200 = vector.load %arg10[%c3_121, %c0_122, %c0_123] : memref<4x8x32xbf16, #tpu.memory_space<vmem>>, vector<1x8x32xbf16>
    %201 = vector.shape_cast %200 : vector<1x8x32xbf16> to vector<8x32xbf16>
    %cst_124 = arith.constant dense<0.000000e+00> : vector<8x32xf32>
    %202 = tpu.matmul %199, %201, %cst_124 {dimension_numbers = #tpu.dot_dimension_numbers<[1], [0], [0], [1], [0, 0, 1, 1], [], []>} : vector<8x8xbf16>, vector<8x32xbf16>, vector<8x32xf32> -> vector<8x32xf32>
    %203 = arith.addf %161, %202 : vector<8x32xf32>
    %c0_125 = arith.constant 0 : index
    %c0_126 = arith.constant 0 : index
    %c0_127 = arith.constant 0 : index
    %204 = vector.load %arg12[%c0_125, %c0_126, %c0_127] : memref<1x8x32xf32, #tpu.memory_space<vmem>>, vector<1x8x32xf32>
    %205 = vector.shape_cast %204 : vector<1x8x32xf32> to vector<8x32xf32>
    %206 = vector.shape_cast %203 : vector<8x32xf32> to vector<1x8x32xf32>
    tpu.vector_store %arg12[%c0_125, %c0_126, %c0_127], %206 {strides = array<i32>} : memref<1x8x32xf32, #tpu.memory_space<vmem>>, vector<1x8x32xf32>,
    return
  }
  func.func @transform_0(%arg0: i32) -> (i32, i32, i32) {
    %c0_i32 = arith.constant 0 : i32
    %c0_i32_0 = arith.constant 0 : i32
    %c0_i32_1 = arith.constant 0 : i32
    return %arg0, %c0_i32, %c0_i32_0 : i32, i32, i32
  }
  func.func @transform_1(%arg0: i32) -> (i32, i32) {
    %c0_i32 = arith.constant 0 : i32
    %c0_i32_0 = arith.constant 0 : i32
    %c0_i32_1 = arith.constant 0 : i32
    return %c0_i32, %c0_i32_0 : i32, i32
  }
  func.func @transform_2(%arg0: i32) -> (i32, i32) {
    %c0_i32 = arith.constant 0 : i32
    %c0_i32_0 = arith.constant 0 : i32
    %c0_i32_1 = arith.constant 0 : i32
    return %c0_i32, %c0_i32_0 : i32, i32
  }
  func.func @transform_3(%arg0: i32) -> (i32, i32, i32) {
    %c0_i32 = arith.constant 0 : i32
    %c0_i32_0 = arith.constant 0 : i32
    %c0_i32_1 = arith.constant 0 : i32
    %c0_i32_2 = arith.constant 0 : i32
    return %c0_i32, %c0_i32_0, %c0_i32_1 : i32, i32, i32
  }
  func.func @transform_4(%arg0: i32) -> (i32, i32, i32) {
    %c0_i32 = arith.constant 0 : i32
    %c0_i32_0 = arith.constant 0 : i32
    %c0_i32_1 = arith.constant 0 : i32
    %c0_i32_2 = arith.constant 0 : i32
    return %c0_i32, %c0_i32_0, %c0_i32_1 : i32, i32, i32
  }
  func.func @transform_5(%arg0: i32) -> (i32, i32, i32) {
    %c0_i32 = arith.constant 0 : i32
    %c0_i32_0 = arith.constant 0 : i32
    %c0_i32_1 = arith.constant 0 : i32
    %c0_i32_2 = arith.constant 0 : i32
    return %c0_i32, %c0_i32_0, %c0_i32_1 : i32, i32, i32
  }
  func.func @transform_6(%arg0: i32) -> (i32, i32, i32) {
    %c0_i32 = arith.constant 0 : i32
    %c0_i32_0 = arith.constant 0 : i32
    %c0_i32_1 = arith.constant 0 : i32
    %c0_i32_2 = arith.constant 0 : i32
    return %c0_i32, %c0_i32_0, %c0_i32_1 : i32, i32, i32
  }
  func.func @transform_7(%arg0: i32) -> (i32, i32, i32) {
    %c0_i32 = arith.constant 0 : i32
    %c0_i32_0 = arith.constant 0 : i32
    %c0_i32_1 = arith.constant 0 : i32
    %c0_i32_2 = arith.constant 0 : i32
    return %c0_i32, %c0_i32_0, %c0_i32_1 : i32, i32, i32
  }
  func.func @transform_8(%arg0: i32) -> (i32, i32, i32) {
    %c0_i32 = arith.constant 0 : i32
    %c0_i32_0 = arith.constant 0 : i32
    %c0_i32_1 = arith.constant 0 : i32
    %c0_i32_2 = arith.constant 0 : i32
    return %c0_i32, %c0_i32_0, %c0_i32_1 : i32, i32, i32
  }
  func.func @transform_9(%arg0: i32) -> (i32, i32, i32) {
    %c0_i32 = arith.constant 0 : i32
    %c0_i32_0 = arith.constant 0 : i32
    %c0_i32_1 = arith.constant 0 : i32
    %c0_i32_2 = arith.constant 0 : i32
    return %c0_i32, %c0_i32_0, %c0_i32_1 : i32, i32, i32
  }
  func.func @transform_10(%arg0: i32) -> (i32, i32) {
    %c0_i32 = arith.constant 0 : i32
    %c0_i32_0 = arith.constant 0 : i32
    %c0_i32_1 = arith.constant 0 : i32
    return %c0_i32, %c0_i32_0 : i32, i32
  }
  func.func @transform_11(%arg0: i32) -> (i32, i32, i32) {
    %c0_i32 = arith.constant 0 : i32
    %c0_i32_0 = arith.constant 0 : i32
    %c0_i32_1 = arith.constant 0 : i32
    return %arg0, %c0_i32, %c0_i32_0 : i32, i32, i32
  }
}

</mosaic_0001>

<bundles_post_ra>
// kernel: tpu_custom_call.1
= control target key start
LH: loop header
LB: loop body
LE: loop exit
PB: predicated region body
PF: predicated region fallthrough
CT: control target
= control target key end

     0   :  { %16 = vsyncpa [#allocation3], 0  ;;  %s2855_s0 = inlined_call_operand.vmem [shape: f32[2,8,32], index: 0, kind: input, shape index: {}]   ;;  %s2856_s1 = inlined_call_operand.vmem [shape: f32[1,32], index: 1, kind: input, shape index: {}]   ;;  %s2857_s2 = inlined_call_operand.vmem [shape: f32[1,32], index: 2, kind: input, shape index: {}]   ;;  %s2858_s3 = inlined_call_operand.vmem [shape: bf16[4,32,8], index: 3, kind: input, shape index: {}]   ;;  %s2859_s4 = inlined_call_operand.vmem [shape: f32[4,1,8], index: 4, kind: input, shape index: {}]   ;;  %s2860_s5 = inlined_call_operand.vmem [shape: bf16[4,32,8], index: 5, kind: input, shape index: {}]   ;;  %s2861_s6 = inlined_call_operand.vmem [shape: f32[4,1,8], index: 6, kind: input, shape index: {}]   ;;  %s2862_s7 = inlined_call_operand.vmem [shape: bf16[4,32,8], index: 7, kind: input, shape index: {}]   ;;  %s2863_s8 = inlined_call_operand.vmem [shape: f32[4,1,8], index: 8, kind: input, shape index: {}]   ;;  %s2864_s9 = inlined_call_operand.vmem [shape: bf16[4,8,32], index: 9, kind: input, shape index: {}]   ;;  %s2865_s10 = inlined_call_operand.vmem [shape: f32[1,32], index: 10, kind: input, shape index: {}]   ;;  %s2866_s11 = inlined_call_operand.hbm [shape: f32[2,8,32], index: 11, kind: output, shape index: {}]  }
   0x1   :  { %18 = vsyncpa [#allocation3 + $0x1], 0  ;;  %s2476_s17 = smov 0   ;;  %s2478_s18 = smov 0  }
   0x2   :  { %s2480_s19 = smov 0   ;;  %s2482_s20 = smov 0  }
   0x3 LB: > { %s2497_s21 = sadd.s32 4294967295, %s2411_s20   ;;  %s1904_s22 = sadd.s32 4294967294, %s2411_s20   ;;  %s2411_s20 = sphi %s2482_s20, %s2872_s20   ;;  %s2407_s19 = sphi %s2480_s19, %s2871_s19   ;;  %s2403_s18 = sphi %s2478_s18, %s2870_s18   ;;  %s2399_s17 = sphi %s2476_s17, %s2869_s17  }
   0x4   : > { %s2501_s23 = sadd.s32 1, %s2411_s20   ;;  %s267_s24 = sadd.s32 1, %s2407_s19 }
   0x5   : > { %s264_s25 = ssub.s32 %s2411_s20, %s2501_s23  ;;  %p277_p0 = scmp.ne.s32.totalorder %s2407_s19, %s2403_s18 }
   0x6   : > { %p265_p1 = scmp.eq.s32.totalorder %s264_s25, 0  ;;  %p278_p2 = scmp.eq.s32.totalorder %s2497_s21, 1 }
   0x7   : > { %p283_p3 = scmp.ne.s32.totalorder %s2403_s18, %s2399_s17  ;;  %p284_p4 = scmp.eq.s32.totalorder %s1904_s22, 1 }
   0x8   : > { %s2512_s26 = scalar_select %p265_p1, %s2407_s19, %s267_s24  }
   0x9   : > { %p2514_p5 = por %p278_p2, %p277_p0  ;;  %p2518_p6 = por %p284_p4, %p283_p3 }
   0xa   : > { %p1907_p7 = scmp.ge.s32.totalorder %s2411_s20, 1  ;;  %p339_p8 = scmp.lt.s32.totalorder %s2411_s20, 3 }
   0xc   : > { %p340_p9 = pnand %p1907_p7, %p339_p8 }
   0xd   : > { %p378_p10 = scmp.lt.s32.totalorder (!%p340_p9), %s2497_s21, 1  ;;  %vm386_vm0 = vcmask (!%p340_p9), 261120   ;;  %v2307_v7 = vld [vmem:[%s2858_s3] sm:$0xff] (!%p340_p9)   ;;  %v2413_v9 = vmov (!%p340_p9), 0.0   ;;  %v2309_v10 = vld [vmem:[%s2858_s3 + $0x8] sm:$0xff] (!%p340_p9)   ;;  %vm2414_vm1 = vmmov (!%p340_p9), 0  }
   0xe   : > { %343 = sbr.rel (%p340_p9) target bundleno = 4457 (0x1169), region = 64  ;;  %v2308_v8 = vld [vmem:[%s2860_s5] sm:$0xff] (!%p340_p9)   ;;  %2085 = vmatprep.subr.bf16.mxu0 (!%p340_p9), %v2413_v9  ;;  %2093 = vmatprep.subr.bf16.mxu1 (!%p340_p9), %v2413_v9  ;;  %v2310_v11 = vld [vmem:[%s2860_s5 + $0x8] sm:$0xff] (!%p340_p9)   ;;  %vm619_vm2 = vcmask (!%p340_p9), 64512   ;;  %vm681_vm3 = vcmask (!%p340_p9), 1043456   ;;  %v2313_v62 = vld [vmem:[%s2858_s3 + $0x10] sm:$0xff] (!%p340_p9)  }
   0xf   : > { %2086 = vmatpush3.bf16.msra.mxu0 (!%p340_p9), %v2307_v7  ;;  %2094 = vmatpush3.bf16.msra.mxu1 (!%p340_p9), %v2308_v8  ;;  %v1910_v16 = vld [vmem:[%s2856_s1] ss:$0 sm:$0xff] (!%p340_p9)  ;;  %v2312_v23 = vld [vmem:[%s2862_s7 + $0x8] sm:$0xff] (!%p340_p9)   ;;  %s375_s25 = sand.u32 (!%p340_p9), 1, %s2403_s18   ;;  %s2022_s13 = sshll.u32 (!%p340_p9), %s2497_s21, 7 }
  0x10   : > { %2087 = vmatprep.subr.bf16.mxu0 (!%p340_p9), %v2413_v9  ;;  %2095 = vmatprep.subr.bf16.mxu1 (!%p340_p9), %v2413_v9  ;;  %v1911_v18 = vld [vmem:[%s2857_s2] ss:$0 sm:$0xff] (!%p340_p9)  ;;  %s2812_s24 = scalar_lea.hbm (!%p340_p9), %s2866_s11, %s2022_s13 }
  0x11   : > { %2089 = vmatprep.mubr.msk.bf16.mxu0 (!%p340_p9), %vm2414_vm1, %v2413_v9  ;;  %2097 = vmatprep.mubr.msk.bf16.mxu1 (!%p340_p9), %vm2414_vm1, %v2413_v9  ;;  %v2311_v21 = vld [vmem:[%s2862_s7] sm:$0xff] (!%p340_p9)  }
  0x12   : > { %v1917_v24 = vld [vmem:[%s2861_s6] ss:$0 sm:$0xff] (!%p340_p9) }
  0x13   : > { %2088 = vmatpush3.bf16.msra.mxu0 (!%p340_p9), %v2309_v10  ;;  %2096 = vmatpush3.bf16.msra.mxu1 (!%p340_p9), %v2310_v11  ;;  %v1913_v35 = vld [vmem:[%s2859_s4] ss:$0 sm:$0xff] (!%p340_p9)  ;;  %v2318_v11 = vld [vmem:[%s2860_s5 + $0x18] sm:$0xff] (!%p340_p9)  }
  0x14   : > { %2101 = vmatprep.subr.bf16.mxu0 (!%p340_p9), %v2413_v9  ;;  %2109 = vmatprep.subr.bf16.mxu1 (!%p340_p9), %v2413_v9  ;;  %v1921_v37 = vld [vmem:[%s2863_s8] ss:$0 sm:$0xff] (!%p340_p9) }
  0x15   : > { %s379_s29 = scalar_select %p378_p10, %s2497_s21, 1  ;;  %v726_v57 = vld [vmem:[%s2864_s9] sm:$0xf] }
  0x16   : > { %v731_v58 = vsel %vm681_vm3, %v726_v57, 0  ;;  %v2323_v57 = vld [vmem:[%s2860_s5 + $0x20] sm:$0xff]   ;;  %s1832_s21 = scalar_lea.sflag [#allocation3], %s375_s25 }
  0x17   : > { %s1909_s30 = sshll.u32 %s379_s29, 3  ;;  %s1908_s29 = sshll.u32 %s375_s25, 3 }
  0x18   : > { %s381_s14 = scalar_lea.vmem %s2855_s0, %s1909_s30  ;;  %s2415_s30 = smov [#allocation2]  }
  0x19   : > { %v2529_v0 = vld [vmem:[%s381_s14] sm:$0xff]  ;;  %s377_s14 = scalar_lea.vmem [#allocation2], %s1908_s29  ;;  %s2353_s12 = sshll.u32 %s2415_s30, 4  ;;  %s2354_s12 = int_to_ptr.vmem [resolvable:$false] %s2353_s12 }
  0x1a   : > { %v387_v1 = vsel %vm386_vm0, %v2529_v0, 0.0  ;;  %s1845_s15 = sshll.u32 %s377_s14, 4  ;;  %s2355_s13 = scalar_lea.vmem %s2354_s12, 256  ;;  %s2814_s15 = int_to_ptr.vmem [resolvable:$true] %s1845_s15 }
  0x1b   : > { %388 = vadd.xlane.f32.xlu0 %v387_v1  ;;  %v2314_v1 = vld [vmem:[%s2858_s3 + $0x18] sm:$0xff]   ;;  %s2349_s29 = scalar_lea.vmem %s2814_s15, 128  ;;  %p2356_p0 = scmp.lt.s32.totalorder %s2814_s15, %s2354_s12 }
  0x1c   : > { %p2350_p11 = scmp.ne.s32.totalorder %s2814_s15, %s2349_s29  ;;  %p2357_p1 = scmp.lt.s32.totalorder %s2355_s13, %s2349_s29 }
  0x1e   : > { %p2351_p12 = pnand %p2350_p11, %p2514_p5  ;;  %p2358_p2 = por %p2357_p1, %p2356_p0 }
  0x20   : > { %p2352_p13 = pneg %p2351_p12 }
  0x22   : > { %p2359_p3 = pnand %p2358_p2, %p2352_p13 }
  0xa8   : > { %v389_v2 = vpop.xlane.xlu0 %388 }
  0xa9   : > { %v391_v3 = vmul.f32 0.03125, %v389_v2  ;;  %v2315_v2 = vld [vmem:[%s2862_s7 + $0x10] sm:$0xff]  }
  0xab   : > { %v392_v4 = vsub.f32 %v2529_v0, %v391_v3  ;;  %v2316_v3 = vld [vmem:[%s2862_s7 + $0x18] sm:$0xff]  }
  0xad   : > { %v393_v5 = vmul.f32 %v392_v4, %v392_v4 }
  0xaf   : > { %v394_v6 = vsel %vm386_vm0, %v393_v5, 0.0  ;;  %v2317_v5 = vld [vmem:[%s2860_s5 + $0x10] sm:$0xff]  }
  0xb0   : > { %395 = vadd.xlane.f32.xlu0 %v394_v6 }
 0x13d   : > { %v396_v12 = vpop.xlane.xlu0 %395 }
 0x13e   : > { %v397_v13 = vmul.f32 0.03125, %v396_v12 }
 0x140   : > { %v398_v14 = vadd.f32 1e-05, %v397_v13 }
 0x142   : > { %2331 = vrsqrt.f32 %v398_v14 }
 0x14c   : > { %v2332_v15 = vpop.eup %2331 }
 0x14d   : > { %v400_v17 = vmul.f32 %v2332_v15, %v392_v4 }
 0x14f   : > { %v407_v19 = vmul.f32 %v1910_v16, %v400_v17  ;;  %v1951_v16 = vld [vmem:[%s2863_s8 + $0x1] ss:$0 sm:$0xff] }
 0x151   : > { %v414_v20 = vadd.f32 %v1911_v18, %v407_v19 }
 0x153   : > { %v2566_v22 = vpack.c.bf16 %v414_v20, %v414_v20 }
 0x155   : > { %2090 = vmatmul.mubr.msk.bf16.vlgmr.msra.gmra.mrb[0].mxu0 %vm386_vm0, %v2566_v22  ;;  %2098 = vmatmul.mubr.msk.bf16.vlgmr.msra.gmra.mrb[0].mxu1 %vm386_vm0, %v2566_v22 }
 0x156   : > { %2102 = vmatpush3.bf16.msra.mxu0 %v2311_v21  ;;  %2105 = vmatprep.mubr.msk.bf16.mxu0 %vm2414_vm1, %v2413_v9 }
 0x157   : > { %2103 = vmatprep.subr.bf16.mxu0 %v2413_v9  ;;  %2111 = vmatprep.mubr.msk.bf16.mxu1 %vm2414_vm1, %v2413_v9 }
 0x15a   : > { %2104 = vmatpush3.bf16.msra.mxu0 %v2312_v23 }
 0x15b   : > { %2115 = vmatprep.subr.bf16.mxu0 %v2413_v9 }
 0x15d   : > { %2106 = vmatmul.mubr.msk.bf16.vlgmr.msra.gmra.mrb[4].mxu0 %vm386_vm0, %v2566_v22 }
 0x15e   : > { %2117 = vmatprep.mubr.msk.bf16.mxu0 %vm2414_vm1, %v2413_v9 }
 0x228   : > { %v484_v25 = vpop.f32.mrb[0].mxu0  ;;  %v548_v26 = vpop.f32.mrb[0].mxu1 }
 0x229   : > { %v549_v27 = vadd.f32 %v1917_v24, %v548_v26  ;;  %v2091_v28 = vpop.f32.mrb[1].mxu0  ;;  %v2099_v29 = vpop.f32.mrb[1].mxu1  ;;  %v485_v38 = vadd.f32 %v1913_v35, %v484_v25  ;;  %v1942_v25 = vld [vmem:[%s2861_s6 + $0x1] ss:$0 sm:$0xff] }
 0x22a   : > { %v487_v30 = vpop.f32.mrb[2].mxu0  ;;  %v551_v31 = vpop.f32.mrb[2].mxu1 }
 0x22b   : > { %v554_v32 = vpack.c.bf16 %v549_v27, %v549_v27  ;;  %v2092_v33 = vpop.f32.mrb[3].mxu0  ;;  %v2100_v34 = vpop.f32.mrb[3].mxu1  ;;  %v490_v43 = vpack.c.bf16 %v485_v38, %v485_v38 }
 0x22d   : > { %v624_v36 = vsel %vm619_vm2, %v554_v32, 0  ;;  %v1933_v32 = vld [vmem:[%s2859_s4 + $0x1] ss:$0 sm:$0xff] }
 0x22e   : > { %2110 = vmatpush3.bf16.xpose.msra.mxu1 %v624_v36 }
 0x22f   : > { %2121 = vmatprep.subr.bf16.mxu1 %v2413_v9 }
 0x230   : > { %v612_v39 = vpop.f32.mrb[4].mxu0 }
 0x231   : > { %v613_v40 = vadd.f32 %v1921_v37, %v612_v39  ;;  %v2107_v41 = vpop.f32.mrb[5].mxu0 }
 0x232   : > { %v615_v42 = vpop.f32.mrb[6].mxu0 }
 0x233   : > { %v618_v44 = vpack.c.bf16 %v613_v40, %v613_v40  ;;  %v2108_v45 = vpop.f32.mrb[7].mxu0 }
 0x235   : > { %v683_v46 = vsel %vm681_vm3, %v618_v44, 0  ;;  %2112 = vmatmul.mubr.msk.bf16.vlgmr.msra.gmra.mrb[4].mxu1 %vm619_vm2, %v490_v43 }
 0x236   : > { %2116 = vmatpush3.bf16.msra.mxu0 %v683_v46  ;;  %2123 = vmatprep.mubr.msk.bf16.mxu1 %vm2414_vm1, %v2413_v9  ;;  %v1957_v46 = vld [vmem:[%s2864_s9 + $0x4] sm:$0xf] }
 0x237   : > { %2127 = vmatprep.subr.bf16.mxu0 %v2413_v9  ;;  %2122 = vmatpush3.bf16.msra.mxu1 %v731_v58 }
 0x238   : > { %2135 = vmatprep.subr.bf16.mxu1 %v2413_v9 }
 0x308   : > { %v660_v47 = vpop.f32.mrb[4].mxu1 }
 0x309   : > { %v2113_v48 = vpop.f32.mrb[5].mxu1  ;;  %v666_v49 = vsel %vm619_vm2, %v660_v47, -inf }
 0x30a   : > { %667 = vmax.xlane.f32.xlu1 %v666_v49  ;;  %v663_v50 = vpop.f32.mrb[6].mxu1 }
 0x30b   : > { %v2114_v51 = vpop.f32.mrb[7].mxu1 }
 0x30c   : > { %v2319_v51 = vld [vmem:[%s2858_s3 + $0x20] sm:$0xff]  }
 0x397   : > { %v668_v52 = vpop.xlane.xlu1 %667 }
 0x398   : > { %v669_v53 = vsub.f32 %v660_v47, %v668_v52  ;;  %v1083_v47 = vsel %vm681_vm3, %v1957_v46, 0  ;;  %v2329_v46 = vld [vmem:[%s2860_s5 + $0x30] sm:$0xff]  }
 0x39a   : > { %v670_v54 = vmul.f32 1.442695, %v669_v53  ;;  %v2320_v53 = vld [vmem:[%s2858_s3 + $0x28] sm:$0xff]  }
 0x39c   : > { %2333 = vpow2.f32 %v670_v54  ;;  %v2321_v54 = vld [vmem:[%s2862_s7 + $0x20] sm:$0xff]  }
 0x3a6   : > { %v2334_v55 = vpop.eup %2333 }
 0x3a7   : > { %v672_v56 = vsel %vm619_vm2, %v2334_v55, 0.0 }
 0x3a8   : > { %673 = vadd.xlane.f32.xlu1 %v672_v56 }
 0x435   : > { %v674_v59 = vpop.xlane.xlu1 %673 }
 0x436   : > { %2335 = vrcp.f32 %v674_v59 }
 0x440   : > { %v2336_v60 = vpop.eup %2335 }
 0x441   : > { %v676_v61 = vmul.f32 %v2336_v60, %v2334_v55  ;;  %v2322_v55 = vld [vmem:[%s2862_s7 + $0x28] sm:$0xff]  }
 0x443   : > { %v677_v63 = vpack.c.bf16 %v676_v61, %v676_v61 }
 0x445   : > { %2118 = vmatmul.mubr.msk.bf16.vlgmr.msra.gmra.mrb[8].mxu0 %vm619_vm2, %v677_v63 }
 0x446   : > { %2128 = vmatpush3.bf16.msra.mxu0 %v2313_v62  ;;  %2131 = vmatprep.mubr.msk.bf16.mxu0 %vm2414_vm1, %v2413_v9  ;;  %v2324_v62 = vld [vmem:[%s2860_s5 + $0x28] sm:$0xff]  }
 0x447   : > { %2129 = vmatprep.subr.bf16.mxu0 %v2413_v9 }
 0x44a   : > { %2130 = vmatpush3.bf16.msra.mxu0 %v2314_v1 }
 0x44b   : > { %2143 = vmatprep.subr.bf16.mxu0 %v2413_v9 }
 0x44d   : > { %2132 = vmatmul.mubr.msk.bf16.vlgmr.msra.gmra.mrb[12].mxu0 %vm386_vm0, %v2566_v22 }
 0x44e   : > { %2144 = vmatpush3.bf16.msra.mxu0 %v2315_v2  ;;  %2147 = vmatprep.mubr.msk.bf16.mxu0 %vm2414_vm1, %v2413_v9 }
 0x44f   : > { %2145 = vmatprep.subr.bf16.mxu0 %v2413_v9 }
 0x452   : > { %2146 = vmatpush3.bf16.msra.mxu0 %v2316_v3 }
 0x453   : > { %2157 = vmatprep.subr.bf16.mxu0 %v2413_v9 }
 0x455   : > { %2148 = vmatmul.mubr.msk.bf16.vlgmr.msra.gmra.mrb[16].mxu0 %vm386_vm0, %v2566_v22 }
 0x456   : > { %2159 = vmatprep.mubr.msk.bf16.mxu0 %vm2414_vm1, %v2413_v9 }
 0x518   : > { %v719_v4 = vpop.f32.mrb[8].mxu0 }
 0x519   : > { %v725_v6 = vpack.c.bf16 %v719_v4, %v719_v4  ;;  %v2119_v7 = vpop.f32.mrb[9].mxu0  ;;  %v1982_v4 = vld [vmem:[%s2863_s8 + $0x2] ss:$0 sm:$0xff] }
 0x51a   : > { %v722_v8 = vpop.f32.mrb[10].mxu0 }
 0x51b   : > { %v2120_v10 = vpop.f32.mrb[11].mxu0  ;;  %2124 = vmatmul.mubr.msk.bf16.vlgmr.msra.gmra.mrb[8].mxu1 %vm619_vm2, %v725_v6 }
 0x51c   : > { %2136 = vmatpush3.bf16.msra.mxu1 %v2317_v5  ;;  %2139 = vmatprep.mubr.msk.bf16.mxu1 %vm2414_vm1, %v2413_v9 }
 0x51d   : > { %2137 = vmatprep.subr.bf16.mxu1 %v2413_v9 }
 0x520   : > { %v833_v12 = vpop.f32.mrb[12].mxu0  ;;  %2138 = vmatpush3.bf16.msra.mxu1 %v2318_v11 }
 0x521   : > { %v2133_v13 = vpop.f32.mrb[13].mxu0  ;;  %2151 = vmatprep.subr.bf16.mxu1 %v2413_v9  ;;  %v834_v34 = vadd.f32 %v1933_v32, %v833_v12 }
 0x522   : > { %v836_v14 = vpop.f32.mrb[14].mxu0  ;;  %v1973_v13 = vld [vmem:[%s2861_s6 + $0x2] ss:$0 sm:$0xff] }
 0x523   : > { %v2134_v15 = vpop.f32.mrb[15].mxu0  ;;  %2140 = vmatmul.mubr.msk.bf16.vlgmr.msra.gmra.mrb[12].mxu1 %vm386_vm0, %v2566_v22  ;;  %v839_v35 = vpack.c.bf16 %v834_v34, %v834_v34 }
 0x524   : > { %2153 = vmatprep.mubr.msk.bf16.mxu1 %vm2414_vm1, %v2413_v9 }
 0x528   : > { %v965_v17 = vpop.f32.mrb[16].mxu0 }
 0x529   : > { %v966_v18 = vadd.f32 %v1951_v16, %v965_v17  ;;  %v2149_v19 = vpop.f32.mrb[17].mxu0 }
 0x52a   : > { %v968_v20 = vpop.f32.mrb[18].mxu0 }
 0x52b   : > { %v971_v21 = vpack.c.bf16 %v966_v18, %v966_v18  ;;  %v2150_v23 = vpop.f32.mrb[19].mxu0  ;;  %v1964_v20 = vld [vmem:[%s2859_s4 + $0x2] ss:$0 sm:$0xff] }
 0x52d   : > { %v1034_v24 = vsel %vm681_vm3, %v971_v21, 0 }
 0x52e   : > { %2158 = vmatpush3.bf16.msra.mxu0 %v1034_v24 }
 0x52f   : > { %2169 = vmatprep.subr.bf16.mxu0 %v2413_v9 }
 0x5f6   : > { %v899_v26 = vpop.f32.mrb[12].mxu1 }
 0x5f7   : > { %v900_v27 = vadd.f32 %v1942_v25, %v899_v26  ;;  %v2141_v28 = vpop.f32.mrb[13].mxu1 }
 0x5f8   : > { %v902_v29 = vpop.f32.mrb[14].mxu1 }
 0x5f9   : > { %v905_v30 = vpack.c.bf16 %v900_v27, %v900_v27  ;;  %v2142_v31 = vpop.f32.mrb[15].mxu1 }
 0x5fb   : > { %v976_v33 = vsel %vm619_vm2, %v905_v30, 0 }
 0x5fc   : > { %2152 = vmatpush3.bf16.xpose.msra.mxu1 %v976_v33 }
 0x5fd   : > { %2163 = vmatprep.subr.bf16.mxu1 %v2413_v9 }
 0x603   : > { %2154 = vmatmul.mubr.msk.bf16.vlgmr.msra.gmra.mrb[16].mxu1 %vm619_vm2, %v839_v35  ;;  %v1988_v35 = vld [vmem:[%s2864_s9 + $0x8] sm:$0xf] }
 0x604   : > { %2165 = vmatprep.mubr.msk.bf16.mxu1 %vm2414_vm1, %v2413_v9  ;;  %2164 = vmatpush3.bf16.msra.mxu1 %v1083_v47 }
 0x605   : > { %2177 = vmatprep.subr.bf16.mxu1 %v2413_v9 }
 0x6d6   : > { %v1012_v36 = vpop.f32.mrb[16].mxu1 }
 0x6d7   : > { %v2155_v37 = vpop.f32.mrb[17].mxu1  ;;  %v1018_v38 = vsel %vm619_vm2, %v1012_v36, -inf }
 0x6d8   : > { %1019 = vmax.xlane.f32.xlu0 %v1018_v38  ;;  %v1015_v39 = vpop.f32.mrb[18].mxu1 }
 0x6d9   : > { %v2156_v40 = vpop.f32.mrb[19].mxu1 }
 0x6da   : > { %v2325_v40 = vld [vmem:[%s2858_s3 + $0x30] sm:$0xff]  }
 0x765   : > { %v1020_v41 = vpop.xlane.xlu0 %1019 }
 0x766   : > { %v1021_v42 = vsub.f32 %v1012_v36, %v1020_v41  ;;  %v1435_v36 = vsel %vm681_vm3, %v1988_v35, 0 }
 0x768   : > { %v1022_v43 = vmul.f32 1.442695, %v1021_v42  ;;  %v2326_v42 = vld [vmem:[%s2858_s3 + $0x38] sm:$0xff]  }
 0x76a   : > { %2337 = vpow2.f32 %v1022_v43  ;;  %v2327_v43 = vld [vmem:[%s2862_s7 + $0x30] sm:$0xff]  }
 0x774   : > { %v2338_v44 = vpop.eup %2337 }
 0x775   : > { %v1024_v45 = vsel %vm619_vm2, %v2338_v44, 0.0 }
 0x776   : > { %1025 = vadd.xlane.f32.xlu1 %v1024_v45 }
 0x803   : > { %v1026_v48 = vpop.xlane.xlu1 %1025 }
 0x804   : > { %2339 = vrcp.f32 %v1026_v48 }
 0x80e   : > { %v2340_v49 = vpop.eup %2339 }
 0x80f   : > { %v1028_v50 = vmul.f32 %v2340_v49, %v2338_v44  ;;  %v2328_v44 = vld [vmem:[%s2862_s7 + $0x38] sm:$0xff]  }
 0x811   : > { %v1029_v52 = vpack.c.bf16 %v1028_v50, %v1028_v50 }
 0x813   : > { %2160 = vmatmul.mubr.msk.bf16.vlgmr.msra.gmra.mrb[20].mxu0 %vm619_vm2, %v1029_v52 }
 0x814   : > { %2170 = vmatpush3.bf16.msra.mxu0 %v2319_v51  ;;  %2173 = vmatprep.mubr.msk.bf16.mxu0 %vm2414_vm1, %v2413_v9  ;;  %v2330_v51 = vld [vmem:[%s2860_s5 + $0x38] sm:$0xff]  }
 0x815   : > { %2171 = vmatprep.subr.bf16.mxu0 %v2413_v9 }
 0x818   : > { %2172 = vmatpush3.bf16.msra.mxu0 %v2320_v53 }
 0x819   : > { %2185 = vmatprep.subr.bf16.mxu0 %v2413_v9 }
 0x81b   : > { %2174 = vmatmul.mubr.msk.bf16.vlgmr.msra.gmra.mrb[24].mxu0 %vm386_vm0, %v2566_v22 }
 0x81c   : > { %2186 = vmatpush3.bf16.msra.mxu0 %v2321_v54  ;;  %2189 = vmatprep.mubr.msk.bf16.mxu0 %vm2414_vm1, %v2413_v9 }
 0x81d   : > { %2187 = vmatprep.subr.bf16.mxu0 %v2413_v9 }
 0x820   : > { %2188 = vmatpush3.bf16.msra.mxu0 %v2322_v55 }
 0x821   : > { %2199 = vmatprep.subr.bf16.mxu0 %v2413_v9 }
 0x823   : > { %2190 = vmatmul.mubr.msk.bf16.vlgmr.msra.gmra.mrb[28].mxu0 %vm386_vm0, %v2566_v22 }
 0x824   : > { %2201 = vmatprep.mubr.msk.bf16.mxu0 %vm2414_vm1, %v2413_v9 }
 0x8e6   : > { %v1070_v56 = vpop.f32.mrb[20].mxu0 }
 0x8e7   : > { %v1076_v58 = vpack.c.bf16 %v1070_v56, %v1070_v56  ;;  %v2161_v59 = vpop.f32.mrb[21].mxu0  ;;  %v2013_v56 = vld [vmem:[%s2863_s8 + $0x3] ss:$0 sm:$0xff] }
 0x8e8   : > { %v1073_v60 = vpop.f32.mrb[22].mxu0 }
 0x8e9   : > { %v2162_v61 = vpop.f32.mrb[23].mxu0  ;;  %2166 = vmatmul.mubr.msk.bf16.vlgmr.msra.gmra.mrb[8].mxu1 %vm619_vm2, %v1076_v58 }
 0x8ea   : > { %2178 = vmatpush3.bf16.msra.mxu1 %v2323_v57  ;;  %2181 = vmatprep.mubr.msk.bf16.mxu1 %vm2414_vm1, %v2413_v9 }
 0x8eb   : > { %2179 = vmatprep.subr.bf16.mxu1 %v2413_v9 }
 0x8ee   : > { %v1185_v63 = vpop.f32.mrb[24].mxu0  ;;  %2180 = vmatpush3.bf16.msra.mxu1 %v2324_v62 }
 0x8ef   : > { %v2175_v1 = vpop.f32.mrb[25].mxu0  ;;  %2193 = vmatprep.subr.bf16.mxu1 %v2413_v9  ;;  %v1186_v23 = vadd.f32 %v1964_v20, %v1185_v63 }
 0x8f0   : > { %v1188_v2 = vpop.f32.mrb[26].mxu0 }
 0x8f1   : > { %v2176_v3 = vpop.f32.mrb[27].mxu0  ;;  %2182 = vmatmul.mubr.msk.bf16.vlgmr.msra.gmra.mrb[20].mxu1 %vm386_vm0, %v2566_v22  ;;  %v1191_v24 = vpack.c.bf16 %v1186_v23, %v1186_v23 }
 0x8f2   : > { %2195 = vmatprep.mubr.msk.bf16.mxu1 %vm2414_vm1, %v2413_v9 }
 0x8f6   : > { %v1317_v5 = vpop.f32.mrb[28].mxu0 }
 0x8f7   : > { %v1318_v6 = vadd.f32 %v1982_v4, %v1317_v5  ;;  %v2191_v7 = vpop.f32.mrb[29].mxu0 }
 0x8f8   : > { %v1320_v8 = vpop.f32.mrb[30].mxu0  ;;  %v1995_v7 = vld [vmem:[%s2859_s4 + $0x3] ss:$0 sm:$0xff] }
 0x8f9   : > { %v1323_v10 = vpack.c.bf16 %v1318_v6, %v1318_v6  ;;  %v2192_v11 = vpop.f32.mrb[31].mxu0 }
 0x8fb   : > { %v1386_v12 = vsel %vm681_vm3, %v1323_v10, 0 }
 0x8fc   : > { %2200 = vmatpush3.bf16.msra.mxu0 %v1386_v12 }
 0x8fd   : > { %2211 = vmatprep.subr.bf16.mxu0 %v2413_v9 }
 0x9c4   : > { %v1251_v14 = vpop.f32.mrb[20].mxu1 }
 0x9c5   : > { %v1252_v15 = vadd.f32 %v1973_v13, %v1251_v14  ;;  %v2183_v16 = vpop.f32.mrb[21].mxu1 }
 0x9c6   : > { %v1254_v17 = vpop.f32.mrb[22].mxu1 }
 0x9c7   : > { %v1257_v18 = vpack.c.bf16 %v1252_v15, %v1252_v15  ;;  %v2184_v19 = vpop.f32.mrb[23].mxu1 }
 0x9c9   : > { %v1328_v21 = vsel %vm619_vm2, %v1257_v18, 0 }
 0x9ca   : > { %2194 = vmatpush3.bf16.xpose.msra.mxu1 %v1328_v21 }
 0x9cb   : > { %2205 = vmatprep.subr.bf16.mxu1 %v2413_v9 }
 0x9d1   : > { %2196 = vmatmul.mubr.msk.bf16.vlgmr.msra.gmra.mrb[24].mxu1 %vm619_vm2, %v1191_v24 }
 0x9d2   : > { %2207 = vmatprep.mubr.msk.bf16.mxu1 %vm2414_vm1, %v2413_v9  ;;  %2206 = vmatpush3.bf16.msra.mxu1 %v1435_v36 }
 0x9d3   : > { %2219 = vmatprep.subr.bf16.mxu1 %v2413_v9 }
 0xaa4   : > { %v1364_v25 = vpop.f32.mrb[24].mxu1 }
 0xaa5   : > { %v2197_v26 = vpop.f32.mrb[25].mxu1  ;;  %v1370_v27 = vsel %vm619_vm2, %v1364_v25, -inf }
 0xaa6   : > { %1371 = vmax.xlane.f32.xlu0 %v1370_v27  ;;  %v1367_v28 = vpop.f32.mrb[26].mxu1 }
 0xaa7   : > { %v2198_v29 = vpop.f32.mrb[27].mxu1 }
 0xb33   : > { %v1372_v30 = vpop.xlane.xlu0 %1371 }
 0xb34   : > { %v1373_v31 = vsub.f32 %v1364_v25, %v1372_v30 }
 0xb36   : > { %v1374_v32 = vmul.f32 1.442695, %v1373_v31 }
 0xb38   : > { %2341 = vpow2.f32 %v1374_v32 }
 0xb42   : > { %v2342_v33 = vpop.eup %2341 }
 0xb43   : > { %v1376_v34 = vsel %vm619_vm2, %v2342_v33, 0.0 }
 0xb44   : > { %1377 = vadd.xlane.f32.xlu1 %v1376_v34 }
 0xbd1   : > { %v1378_v37 = vpop.xlane.xlu1 %1377 }
 0xbd2   : > { %2343 = vrcp.f32 %v1378_v37 }
 0xbdc   : > { %v2344_v38 = vpop.eup %2343 }
 0xbdd   : > { %v1380_v39 = vmul.f32 %v2344_v38, %v2342_v33  ;;  %v1912_v33 = vld [vmem:[%s2865_s10] ss:$0 sm:$0xff] }
 0xbde   : > { %v423_v34 = vadd.f32 %v1912_v33, %v2529_v0 }
 0xbdf   : > { %v1381_v41 = vpack.c.bf16 %v1380_v39, %v1380_v39 }
 0xbe1   : > { %2202 = vmatmul.mubr.msk.bf16.vlgmr.msra.gmra.mrb[32].mxu0 %vm619_vm2, %v1381_v41 }
 0xbe2   : > { %2212 = vmatpush3.bf16.msra.mxu0 %v2325_v40  ;;  %2215 = vmatprep.mubr.msk.bf16.mxu0 %vm2414_vm1, %v2413_v9 }
 0xbe3   : > { %2213 = vmatprep.subr.bf16.mxu0 %v2413_v9 }
 0xbe6   : > { %2214 = vmatpush3.bf16.msra.mxu0 %v2326_v42 }
 0xbe7   : > { %2227 = vmatprep.subr.bf16.mxu0 %v2413_v9 }
 0xbe9   : > { %2216 = vmatmul.mubr.msk.bf16.vlgmr.msra.gmra.mrb[36].mxu0 %vm386_vm0, %v2566_v22 }
 0xbea   : > { %2228 = vmatpush3.bf16.msra.mxu0 %v2327_v43  ;;  %2231 = vmatprep.mubr.msk.bf16.mxu0 %vm2414_vm1, %v2413_v9 }
 0xbeb   : > { %2229 = vmatprep.subr.bf16.mxu0 %v2413_v9 }
 0xbee   : > { %2230 = vmatpush3.bf16.msra.mxu0 %v2328_v44 }
 0xbef   : > { %2241 = vmatprep.subr.bf16.mxu0 %v2413_v9 }
 0xbf1   : > { %2232 = vmatmul.mubr.msk.bf16.vlgmr.msra.gmra.mrb[40].mxu0 %vm386_vm0, %v2566_v22 }
 0xbf2   : > { %2243 = vmatprep.mubr.msk.bf16.mxu0 %vm2414_vm1, %v2413_v9 }
 0xcb4   : > { %v1422_v45 = vpop.f32.mrb[32].mxu0 }
 0xcb5   : > { %v1428_v47 = vpack.c.bf16 %v1422_v45, %v1422_v45  ;;  %v2203_v48 = vpop.f32.mrb[33].mxu0 }
 0xcb6   : > { %v1425_v49 = vpop.f32.mrb[34].mxu0 }
 0xcb7   : > { %v2204_v50 = vpop.f32.mrb[35].mxu0  ;;  %2208 = vmatmul.mubr.msk.bf16.vlgmr.msra.gmra.mrb[8].mxu1 %vm619_vm2, %v1428_v47 }
 0xcb8   : > { %2220 = vmatpush3.bf16.msra.mxu1 %v2329_v46  ;;  %2223 = vmatprep.mubr.msk.bf16.mxu1 %vm2414_vm1, %v2413_v9 }
 0xcb9   : > { %2221 = vmatprep.subr.bf16.mxu1 %v2413_v9 }
 0xcbc   : > { %v1537_v52 = vpop.f32.mrb[36].mxu0  ;;  %2222 = vmatpush3.bf16.msra.mxu1 %v2330_v51 }
 0xcbd   : > { %v2217_v53 = vpop.f32.mrb[37].mxu0  ;;  %2235 = vmatprep.subr.bf16.mxu1 %v2413_v9  ;;  %v1538_v10 = vadd.f32 %v1995_v7, %v1537_v52 }
 0xcbe   : > { %v1540_v54 = vpop.f32.mrb[38].mxu0 }
 0xcbf   : > { %v2218_v55 = vpop.f32.mrb[39].mxu0  ;;  %2224 = vmatmul.mubr.msk.bf16.vlgmr.msra.gmra.mrb[28].mxu1 %vm386_vm0, %v2566_v22  ;;  %v2004_v22 = vld [vmem:[%s2861_s6 + $0x3] ss:$0 sm:$0xff]  ;;  %v1543_v11 = vpack.c.bf16 %v1538_v10, %v1538_v10 }
 0xcc0   : > { %2237 = vmatprep.mubr.msk.bf16.mxu1 %vm2414_vm1, %v2413_v9 }
 0xcc4   : > { %v1669_v57 = vpop.f32.mrb[40].mxu0 }
 0xcc5   : > { %v1670_v58 = vadd.f32 %v2013_v56, %v1669_v57  ;;  %v2233_v59 = vpop.f32.mrb[41].mxu0 }
 0xcc6   : > { %v1672_v60 = vpop.f32.mrb[42].mxu0 }
 0xcc7   : > { %v1675_v61 = vpack.c.bf16 %v1670_v58, %v1670_v58  ;;  %v2234_v62 = vpop.f32.mrb[43].mxu0 }
 0xcc9   : > { %v1738_v63 = vsel %vm681_vm3, %v1675_v61, 0 }
 0xcca   : > { %2242 = vmatpush3.bf16.msra.mxu0 %v1738_v63 }
 0xd92   : > { %v1603_v1 = vpop.f32.mrb[28].mxu1 }
 0xd93   : > { %v1604_v2 = vadd.f32 %v2004_v22, %v1603_v1  ;;  %v2225_v3 = vpop.f32.mrb[29].mxu1 }
 0xd94   : > { %v1606_v4 = vpop.f32.mrb[30].mxu1 }
 0xd95   : > { %v1609_v5 = vpack.c.bf16 %v1604_v2, %v1604_v2  ;;  %v2226_v6 = vpop.f32.mrb[31].mxu1 }
 0xd97   : > { %v1680_v8 = vsel %vm619_vm2, %v1609_v5, 0 }
 0xd98   : > { %2236 = vmatpush3.bf16.xpose.msra.mxu1 %v1680_v8 }
 0xd99   : > { %2247 = vmatprep.subr.bf16.mxu1 %v2413_v9 }
 0xd9f   : > { %2238 = vmatmul.mubr.msk.bf16.vlgmr.msra.gmra.mrb[32].mxu1 %vm619_vm2, %v1543_v11 }
 0xda0   : > { %2249 = vmatprep.mubr.msk.bf16.mxu1 %vm2414_vm1, %v2413_v9  ;;  %v2019_v9 = vld [vmem:[%s2864_s9 + $0xc] sm:$0xf] }
 0xda1   : > { %v1787_v23 = vsel %vm681_vm3, %v2019_v9, 0 }
 0xda2   : > { %2248 = vmatpush3.bf16.msra.mxu1 %v1787_v23 }
 0xe72   : > { %v1716_v12 = vpop.f32.mrb[32].mxu1 }
 0xe73   : > { %v2239_v13 = vpop.f32.mrb[33].mxu1  ;;  %v1722_v14 = vsel %vm619_vm2, %v1716_v12, -inf }
 0xe74   : > { %1723 = vmax.xlane.f32.xlu0 %v1722_v14  ;;  %v1719_v15 = vpop.f32.mrb[34].mxu1 }
 0xe75   : > { %v2240_v16 = vpop.f32.mrb[35].mxu1 }
 0xf01   : > { %v1724_v17 = vpop.xlane.xlu0 %1723 }
 0xf02   : > { %v1725_v18 = vsub.f32 %v1716_v12, %v1724_v17 }
 0xf04   : > { %v1726_v19 = vmul.f32 1.442695, %v1725_v18 }
 0xf06   : > { %2345 = vpow2.f32 %v1726_v19 }
 0xf10   : > { %v2346_v20 = vpop.eup %2345 }
 0xf11   : > { %v1728_v21 = vsel %vm619_vm2, %v2346_v20, 0.0 }
 0xf12   : > { %1729 = vadd.xlane.f32.xlu1 %v1728_v21 }
 0xf9f   : > { %v1730_v24 = vpop.xlane.xlu1 %1729 }
 0xfa0   : > { %2347 = vrcp.f32 %v1730_v24 }
 0xfaa   : > { %v2348_v25 = vpop.eup %2347 }
 0xfab   : > { %v1732_v26 = vmul.f32 %v2348_v25, %v2346_v20 }
 0xfad   : > { %v1733_v27 = vpack.c.bf16 %v1732_v26, %v1732_v26 }
 0xfaf   : > { %2244 = vmatmul.mubr.msk.bf16.vlgmr.msra.gmra.mrb[44].mxu0 %vm619_vm2, %v1733_v27 }
0x1082   : > { %v1774_v28 = vpop.f32.mrb[44].mxu0 }
0x1083   : > { %v1780_v29 = vpack.c.bf16 %v1774_v28, %v1774_v28  ;;  %v2245_v30 = vpop.f32.mrb[45].mxu0 }
0x1084   : > { %v1777_v31 = vpop.f32.mrb[46].mxu0 }
0x1085   : > { %v2246_v32 = vpop.f32.mrb[47].mxu0  ;;  %2250 = vmatmul.mubr.msk.bf16.vlgmr.msra.gmra.mrb[8].mxu1 %vm619_vm2, %v1780_v29 }
0x1158   : > { %v1823_v35 = vpop.f32.mrb[8].mxu1 }
0x1159   : > { %v2253_v36 = vadd.f32 %v1823_v35, %v423_v34  ;;  %v2251_v37 = vpop.f32.mrb[9].mxu1 }
0x115a   : > { %v1826_v38 = vpop.f32.mrb[10].mxu1 }
0x115b   : > { %v2252_v39 = vpop.f32.mrb[11].mxu1  ;;  %1830 = vst.msk [vmem:[%s377_s14] sm:$0xff] %vm386_vm0, %v2253_v36 }
0x115c   : > { %2362 = shalt.err (!%p2359_p3)
}
0x115d   : > { %s2363_s25 = scalar_lea.hbm %s2812_s24, 128  ;;  %s2367_s22 = scalar_lea.hbm %s2866_s11, 256 }
0x115e   : > { %p2364_p4 = scmp.ne.s32.totalorder %s2812_s24, %s2363_s25  ;;  %p2368_p9 = scmp.lt.u32.totalorder %s2812_s24, %s2866_s11 }
0x115f   : > { %p2369_p10 = scmp.lt.u32.totalorder %s2367_s22, %s2363_s25  ;;  %p2371_p12 = scmp.lt.u32.totalorder %s2363_s25, %s2812_s24 }
0x1160   : > { %p2365_p7 = pnand %p2364_p4, %p2514_p5 }
0x1161   : > { %p2370_p11 = por %p2369_p10, %p2368_p9 }
0x1162   : > { %p2366_p8 = pneg %p2365_p7 }
0x1163   : > { %p2372_p13 = por %p2371_p12, %p2370_p11 }
0x1165   : > { %p2373_p0 = pnand %p2372_p13, %p2366_p8 }
0x1167   : > { %2376 = shalt.err (!%p2373_p0)
}
0x1168   : > { %2266 = dma.vmem_to_hbm [thread:$0]  (%p2514_p5), %s2814_s15, 128, %s2812_s24, %s1832_s21  }
0x1169 PF: > { %p2272_p1 = scmp.ge.s32.totalorder %s2411_s20, 2  ;;  %s1857_s29 = sand.u32 1, %s2399_s17  }
0x116a   : > { %s1858_s13 = scalar_lea.sflag [#allocation3], %s1857_s29 }
0x116b   : > { %p2269_p2 = pnand %p2272_p1, %p2518_p6 }
0x116d   : > { %2394 = dma.done.wait (!%p2269_p2), %s1858_s13, 128  }
0x116e   : > { %2396 = vsyncadd (!%p2269_p2), %s1858_s13, 4294967168  ;;  %p21_p3 = scmp.ge.s32.totalorder %s2501_s23, 4   ;;  %s2869_s17 = smov %s2403_s18 }
0x116f   : > { %s2870_s18 = smov %s2407_s19  ;;  %s2871_s19 = smov %s2512_s26 }
0x1170   : > { %s2872_s20 = smov %s2501_s23  ;;  %23 = sbr.rel (!%p21_p3) target bundleno = 3 (0x3), region = 120 }
0x1177   :  { %1863 = vsyncpa [#allocation3], 1 }
0x1178   :  { %1865 = vsyncpa [#allocation3 + $0x1], 1 }

</bundles_post_ra>
